<compile_context>
chip_gen: v7x
topology: tpu7x:2x2x1
jax: 0.10.0
libtpu: 0.0.40
codegen_flags: <defaults>
</compile_context>

<pallas_src>
import functools

import jax
import jax.numpy as jnp
from jax.experimental import pallas as pl
from jax.experimental.pallas import tpu as pltpu


def _round_up(v, m):
    return (v + m - 1) // m * m


# ----------------------------------------------------------------------------
# Fused kernel: one batch tile -> final encoder output rows.
# ----------------------------------------------------------------------------
def _ecg_fused_kernel(x_ref, w1_ref, b1_ref, w2_ref, b2_ref, w3_ref, b3_ref,
                      wl_ref, bl_ref, o_ref, halo_ref, *, tb, l8, out_features):
    """Per grid step:
       x_ref   : (1, rows, 8*C_in) bf16, rows = tb*l8, row = j*tb + b,
                 lane = p*C_in + c   (p = position phase within an 8-block)
       wK_ref  : (2, K_in, 64) bf16  -- [0]=main block weight, [1]=halo tap
       bK_ref  : (1, 64) f32         -- bias tiled over the layer's phases
       wl_ref  : (l8*64, out) bf16   -- linear weight, row index = j*64 + c
       bl_ref  : (1, out) f32
       o_ref   : (tb, out) f32
       halo_ref: (tb + rows, 64) bf16 scratch; rows [0, tb) stay zero and act
                 as the conv left zero-padding of the first position block.
    """
    f32, bf16 = jnp.float32, jnp.bfloat16
    rows = tb * l8

    # Zero the halo region (cheap: tb x 64) once per step.
    halo_ref[pl.ds(0, tb), :] = jnp.zeros((tb, 64), bf16)

    def conv_layer(h, w_ref_, b_ref_):
        # Taps that read the current position block: one matmul, all phases.
        main = jnp.dot(h, w_ref_[0], preferred_element_type=f32)
        # Tap that reads the previous block's last phase: compute it for every
        # block, stage it one block lower in the halo scratch, and read it back
        # shifted; block j==0 then picks up the zero halo (== conv padding).
        tap = jnp.dot(h, w_ref_[1], preferred_element_type=f32)
        halo_ref[pl.ds(tb, rows), :] = tap.astype(bf16)
        halo = halo_ref[pl.ds(0, rows), :]
        return jnp.maximum(main + halo.astype(f32) + b_ref_[...], 0.0).astype(bf16)

    x = x_ref[0]                                   # (rows, 8*C_in) bf16
    h = conv_layer(x, w1_ref, b1_ref)              # Conv1d(C_in->16)+ReLU, (rows, 64)
    h = conv_layer(h, w2_ref, b2_ref)              # Conv1d(16->32)+ReLU,   (rows, 64)
    h = conv_layer(h, w3_ref, b3_ref)              # Conv1d(32->64)+ReLU,   (rows, 64)

    # Stage the conv output (bf16, once) for the K-chunked flatten+linear;
    # reuse the halo scratch region [tb, tb+rows).
    halo_ref[pl.ds(tb, rows), :] = h

    # Flatten (torch NCL order folded into wl) + Linear: rolled loop over the
    # l8 position blocks; each chunk is a contiguous (tb,64)x(64,out) matmul.
    def body(j, acc):
        r0 = pl.multiple_of((j + 1) * tb, 16)      # rows of position block j
        k0 = pl.multiple_of(j * 64, 64)            # matching linear-weight rows
        a = halo_ref[pl.ds(r0, tb), :]
        w = wl_ref[pl.ds(k0, 64), :]
        return acc + jnp.dot(a, w, preferred_element_type=f32)

    acc = jax.lax.fori_loop(0, l8, body, jnp.zeros((tb, out_features), f32))
    o_ref[...] = acc + bl_ref[...]


# ----------------------------------------------------------------------------
# pallas_call wrapper (grid over batch tiles, parallel on megacore).
# ----------------------------------------------------------------------------
def _fused_forward(xp, p, *, b_pad, tb, l8, c_in, out_features, vmem_limit):
    nb = b_pad // tb
    rows = tb * l8
    kernel = functools.partial(_ecg_fused_kernel, tb=tb, l8=l8,
                               out_features=out_features)

    flops = 2 * b_pad * l8 * (4 * 3 * c_in * 16 + 2 * 3 * 16 * 32
                              + 3 * 32 * 64 + 64 * out_features)
    bytes_accessed = (xp.size * 2
                      + sum(int(v.size) * v.dtype.itemsize for v in p.values())
                      + b_pad * out_features * 4)

    # Whole-array VMEM residents: single-buffered, DMA'd once for all steps.
    vmem_const = pl.BlockSpec(memory_space=pltpu.MemorySpace.VMEM)

    return pl.pallas_call(
        kernel,
        out_shape=jax.ShapeDtypeStruct((b_pad, out_features), jnp.float32),
        grid_spec=pltpu.PrefetchScalarGridSpec(
            num_scalar_prefetch=0,
            grid=(nb,),
            in_specs=[
                pl.BlockSpec((1, rows, 8 * c_in), lambda i: (i, 0, 0)),
                vmem_const, vmem_const, vmem_const, vmem_const,
                vmem_const, vmem_const, vmem_const, vmem_const,
            ],
            out_specs=pl.BlockSpec((tb, out_features), lambda i: (i, 0)),
            scratch_shapes=[pltpu.VMEM((tb + rows, 64), jnp.bfloat16)],
        ),
        compiler_params=pltpu.CompilerParams(
            dimension_semantics=("parallel",),
            vmem_limit_bytes=vmem_limit,
        ),
        cost_estimate=pl.CostEstimate(
            flops=int(flops), transcendentals=0,
            bytes_accessed=int(bytes_accessed)),
    )(xp, p["w1"], p["b1"], p["w2"], p["b2"], p["w3"], p["b3"],
      p["wl"], p["bl"])


def _choose_batch_tile(batch, l8, c_in):
    """Batch tile: multiple of 16 (bf16 sublane pack), up to 128, >=2 grid
    steps when possible, capped so one step's activations fit VMEM."""
    b16 = _round_up(batch, 16)
    if b16 <= 16:
        tb = b16
    elif b16 <= 256:
        tb = _round_up(pl.cdiv(b16, 2), 16)       # two grid steps (v7x: 2 TCs)
    else:
        tb = 128
    # bf16 input block (double-buffered) + bf16 halo/staging scratch + live
    # fp32 temporaries, per row.
    per_row_bytes = 2 * (8 * c_in) * 2 + 64 * 2 + 3 * 64 * 4
    budget = 24 * 1024 * 1024
    while tb > 16 and tb * l8 * per_row_bytes > budget:
        tb -= 16
    return _round_up(b16, tb), tb


def _vmem_limit_bytes():
    try:
        cap = int(pltpu.get_tpu_info().vmem_capacity_bytes)
    except Exception:
        cap = 64 * 1024 * 1024                     # conservative (v7x physical)
    # ~5/8 of physical: ~40 MiB on v7x, ~80 MiB on v5e/v6e.
    return max(32 * 1024 * 1024, min(cap * 5 // 8, 100 * 1024 * 1024))


@jax.jit
def ecg_encoder_forward(x_ncl, kparams):
    """x_ncl: (B, channels, seq_length) f32 -> (B, output_size) f32."""
    B, C, L = x_ncl.shape
    assert L % 8 == 0, "seq_length must be divisible by 8 (three stride-2 convs)"
    l8 = L // 8
    out_features = kparams["bl"].shape[-1]
    b_pad, tb = _choose_batch_tile(B, l8, C)
    nb = b_pad // tb

    x = x_ncl
    if b_pad != B:
        x = jnp.pad(x, ((0, b_pad - B), (0, 0), (0, 0)))
    # NCL -> (nb, rows, 8*C): row = j*tb + b (position-block-major,
    # batch-minor), lane = p*C + c (phase-major, channel-minor), bf16.
    # (bf16 input is within tolerance here; keep fp32 if dynamic range demands.)
    x = jnp.transpose(x, (0, 2, 1))                       # (b_pad, L, C)
    x = x.reshape(nb, tb, l8, 8, C).transpose(0, 2, 1, 3, 4)
    xp = x.reshape(nb, tb * l8, 8 * C).astype(jnp.bfloat16)

    out = _fused_forward(xp, kparams, b_pad=b_pad, tb=tb, l8=l8, c_in=C,
                         out_features=out_features,
                         vmem_limit=_vmem_limit_bytes())
    return out[:B]


# ----------------------------------------------------------------------------
# Parameters (PyTorch-equivalent shapes / init) + kernel-ready packing.
# ----------------------------------------------------------------------------
def init_params(key, channels, seq_length, output_size):
    conv_specs = [(channels, 16), (16, 32), (32, 64)]
    convs = []
    k = key
    for cin, cout in conv_specs:
        k, kw, kb = jax.random.split(k, 3)
        bound = (3 * cin) ** -0.5
        w = jax.random.uniform(kw, (3, cin, cout), jnp.float32, -bound, bound)
        b = jax.random.uniform(kb, (cout,), jnp.float32, -bound, bound)
        convs.append((w, b))
    in_features = 64 * seq_length // 8
    k, kw, kb = jax.random.split(k, 3)
    bound = in_features ** -0.5
    wl = jax.random.uniform(kw, (in_features, output_size), jnp.float32,
                            -bound, bound)
    bl = jax.random.uniform(kb, (output_size,), jnp.float32, -bound, bound)
    return convs, (wl, bl)


def _pack_conv(w, n_in_phases, n_out_phases):
    """Block-structured polyphase weights.  w: (3, cin, cout).
    Returns (2, n_in_phases*cin, n_out_phases*cout):
      [0] main: taps reading the current position block,
      [1] halo: the tap reading the previous block's last phase."""
    _, cin, cout = w.shape
    main = jnp.zeros((n_in_phases, cin, n_out_phases, cout), w.dtype)
    halo = jnp.zeros((n_in_phases, cin, n_out_phases, cout), w.dtype)
    for q in range(n_out_phases):            # output phase within a block
        for k in range(3):                   # conv tap -> input phase 2q-1+k
            p = 2 * q - 1 + k
            if p < 0:
                halo = halo.at[n_in_phases - 1, :, q, :].set(w[k])
            else:
                main = main.at[p, :, q, :].set(w[k])
    shape2d = (n_in_phases * cin, n_out_phases * cout)
    return jnp.stack([main.reshape(shape2d), halo.reshape(shape2d)], axis=0)


def prepare_params(convs, linear, seq_length):
    """bf16 block-polyphase matmul weights, fp32 (1, N) phase-tiled biases,
    nn.Flatten's channel-major order folded into the Linear weight."""
    l8 = seq_length // 8
    (w1, b1), (w2, b2), (w3, b3) = convs
    wl, bl = linear
    # torch feature index c*l8 + j  ->  kernel row index j*64 + c
    wl_perm = jnp.transpose(wl.reshape(64, l8, -1), (1, 0, 2)).reshape(64 * l8, -1)
    bf = lambda a: a.astype(jnp.bfloat16)
    tile_b = lambda b, reps: jnp.tile(b, reps).reshape(1, -1).astype(jnp.float32)
    return dict(
        w1=bf(_pack_conv(w1, 8, 4)), b1=tile_b(b1, 4),
        w2=bf(_pack_conv(w2, 4, 2)), b2=tile_b(b2, 2),
        w3=bf(_pack_conv(w3, 2, 1)), b3=tile_b(b3, 1),
        wl=bf(wl_perm), bl=bl.reshape(1, -1).astype(jnp.float32))


def reference_forward(x_ncl, convs, linear):
    """Pure-jnp fp32 reference with the exact PyTorch module semantics."""
    h = jnp.transpose(x_ncl, (0, 2, 1))                     # (B, L, C)
    for w, b in convs:                                      # w: (3, Cin, Cout)
        l_out = h.shape[1] // 2
        hp = jnp.pad(h, ((0, 0), (1, 1), (0, 0)))
        y = sum(hp[:, k:k + 2 * l_out:2, :] @ w[k] for k in range(3)) + b
        h = jnp.maximum(y, 0.0)
    flat = jnp.transpose(h, (0, 2, 1)).reshape(h.shape[0], -1)  # nn.Flatten (NCL)
    wl, bl = linear
    return flat @ wl + bl


if __name__ == "__main__":
    batch, channels, seq_length, output_size = 2, 4, 16, 32

    key = jax.random.PRNGKey(0)
    k_x, k_p = jax.random.split(key)
    x = jax.random.normal(k_x, (batch, channels, seq_length), dtype=jnp.float32)

    convs, linear = init_params(k_p, channels, seq_length, output_size)
    kparams = prepare_params(convs, linear, seq_length)

    out = jax.block_until_ready(ecg_encoder_forward(x, kparams))
    assert out.shape == (batch, output_size), out.shape

    ref = reference_forward(x, convs, linear)
    max_err = float(jnp.max(jnp.abs(out - ref)))
    assert bool(jnp.all(jnp.isfinite(out)))
    assert max_err < 5e-2, f"kernel/reference mismatch, max abs err={max_err}"
    print("KERNEL_OK")
</pallas_src>

<mosaic_0001>
module attributes {stable_mosaic.version = 11 : i64} {
  func.func @_ecg_fused_kernel(%arg0: i32, %arg1: memref<1x32x32xbf16, #tpu.memory_space<vmem>>, %arg2: memref<2x32x64xbf16, #tpu.memory_space<vmem>>, %arg3: memref<1x64xf32, #tpu.memory_space<vmem>>, %arg4: memref<2x64x64xbf16, #tpu.memory_space<vmem>>, %arg5: memref<1x64xf32, #tpu.memory_space<vmem>>, %arg6: memref<2x64x64xbf16, #tpu.memory_space<vmem>>, %arg7: memref<1x64xf32, #tpu.memory_space<vmem>>, %arg8: memref<128x32xbf16, #tpu.memory_space<vmem>>, %arg9: memref<1x32xf32, #tpu.memory_space<vmem>>, %arg10: memref<16x32xf32, #tpu.memory_space<vmem>>, %arg11: memref<48x64xbf16, #tpu.memory_space<vmem>>) attributes {dimension_semantics = [#tpu.dimension_semantics<parallel>], iteration_bounds = array<i64: 1>, scalar_prefetch = 0 : i64, scratch_operands = 1 : i64, tpu.core_type = #tpu.core_type<tc>, window_params = [{transform_indices = @transform_0, window_bounds = array<i64: 1, 32, 32>}, {pipeline_mode = #tpu.pipeline_mode<synchronous>, transform_indices = @transform_1, window_bounds = array<i64: 2, 32, 64>}, {pipeline_mode = #tpu.pipeline_mode<synchronous>, transform_indices = @transform_2, window_bounds = array<i64: 1, 64>}, {pipeline_mode = #tpu.pipeline_mode<synchronous>, transform_indices = @transform_3, window_bounds = array<i64: 2, 64, 64>}, {pipeline_mode = #tpu.pipeline_mode<synchronous>, transform_indices = @transform_4, window_bounds = array<i64: 1, 64>}, {pipeline_mode = #tpu.pipeline_mode<synchronous>, transform_indices = @transform_5, window_bounds = array<i64: 2, 64, 64>}, {pipeline_mode = #tpu.pipeline_mode<synchronous>, transform_indices = @transform_6, window_bounds = array<i64: 1, 64>}, {pipeline_mode = #tpu.pipeline_mode<synchronous>, transform_indices = @transform_7, window_bounds = array<i64: 128, 32>}, {pipeline_mode = #tpu.pipeline_mode<synchronous>, transform_indices = @transform_8, window_bounds = array<i64: 1, 32>}, {transform_indices = @transform_9, window_bounds = array<i64: 16, 32>}]} {
    %cst = arith.constant 0.000000e+00 : bf16
    %0 = vector.broadcast %cst : bf16 to vector<16x64xbf16>
    %c0 = arith.constant 0 : index
    %c0_0 = arith.constant 0 : index
    %1 = vector.load %arg11[%c0, %c0_0] : memref<48x64xbf16, #tpu.memory_space<vmem>>, vector<16x64xbf16>
    tpu.vector_store %arg11[%c0, %c0_0], %0 {strides = array<i32>} : memref<48x64xbf16, #tpu.memory_space<vmem>>, vector<16x64xbf16>,
    %c0_1 = arith.constant 0 : index
    %c0_2 = arith.constant 0 : index
    %c0_3 = arith.constant 0 : index
    %2 = vector.load %arg1[%c0_1, %c0_2, %c0_3] : memref<1x32x32xbf16, #tpu.memory_space<vmem>>, vector<1x32x32xbf16>
    %3 = vector.shape_cast %2 : vector<1x32x32xbf16> to vector<32x32xbf16>
    %c0_4 = arith.constant 0 : index
    %c0_5 = arith.constant 0 : index
    %c0_6 = arith.constant 0 : index
    %4 = vector.load %arg2[%c0_4, %c0_5, %c0_6] : memref<2x32x64xbf16, #tpu.memory_space<vmem>>, vector<1x32x64xbf16>
    %5 = vector.shape_cast %4 : vector<1x32x64xbf16> to vector<32x64xbf16>
    %cst_7 = arith.constant dense<0.000000e+00> : vector<32x64xf32>
    %6 = tpu.matmul %3, %5, %cst_7 {dimension_numbers = #tpu.dot_dimension_numbers<[1], [0], [0], [1], [0, 0, 1, 1], [], []>} : vector<32x32xbf16>, vector<32x64xbf16>, vector<32x64xf32> -> vector<32x64xf32>
    %c1 = arith.constant 1 : index
    %c0_8 = arith.constant 0 : index
    %c0_9 = arith.constant 0 : index
    %7 = vector.load %arg2[%c1, %c0_8, %c0_9] : memref<2x32x64xbf16, #tpu.memory_space<vmem>>, vector<1x32x64xbf16>
    %8 = vector.shape_cast %7 : vector<1x32x64xbf16> to vector<32x64xbf16>
    %cst_10 = arith.constant dense<0.000000e+00> : vector<32x64xf32>
    %9 = tpu.matmul %3, %8, %cst_10 {dimension_numbers = #tpu.dot_dimension_numbers<[1], [0], [0], [1], [0, 0, 1, 1], [], []>} : vector<32x32xbf16>, vector<32x64xbf16>, vector<32x64xf32> -> vector<32x64xf32>
    %10 = arith.truncf %9 : vector<32x64xf32> to vector<32x64xbf16>
    %c16 = arith.constant 16 : index
    %c0_11 = arith.constant 0 : index
    %11 = vector.load %arg11[%c16, %c0_11] : memref<48x64xbf16, #tpu.memory_space<vmem>>, vector<32x64xbf16>
    tpu.vector_store %arg11[%c16, %c0_11], %10 {strides = array<i32>} : memref<48x64xbf16, #tpu.memory_space<vmem>>, vector<32x64xbf16>,
    %c0_12 = arith.constant 0 : index
    %c0_13 = arith.constant 0 : index
    %12 = vector.load %arg11[%c0_12, %c0_13] : memref<48x64xbf16, #tpu.memory_space<vmem>>, vector<32x64xbf16>
    %13 = arith.extf %12 : vector<32x64xbf16> to vector<32x64xf32>
    %14 = arith.addf %6, %13 : vector<32x64xf32>
    %c0_14 = arith.constant 0 : index
    %c0_15 = arith.constant 0 : index
    %15 = vector.load %arg3[%c0_14, %c0_15] : memref<1x64xf32, #tpu.memory_space<vmem>>, vector<1x64xf32>
    %16 = vector.broadcast %15 : vector<1x64xf32> to vector<32x64xf32>
    %17 = arith.addf %14, %16 : vector<32x64xf32>
    %cst_16 = arith.constant 0.000000e+00 : f32
    %18 = vector.broadcast %cst_16 : f32 to vector<32x64xf32>
    %19 = arith.maximumf %17, %18 : vector<32x64xf32>
    %20 = arith.truncf %19 : vector<32x64xf32> to vector<32x64xbf16>
    %c0_17 = arith.constant 0 : index
    %c0_18 = arith.constant 0 : index
    %c0_19 = arith.constant 0 : index
    %21 = vector.load %arg4[%c0_17, %c0_18, %c0_19] : memref<2x64x64xbf16, #tpu.memory_space<vmem>>, vector<1x64x64xbf16>
    %22 = vector.shape_cast %21 : vector<1x64x64xbf16> to vector<64x64xbf16>
    %cst_20 = arith.constant dense<0.000000e+00> : vector<32x64xf32>
    %23 = tpu.matmul %20, %22, %cst_20 {dimension_numbers = #tpu.dot_dimension_numbers<[1], [0], [0], [1], [0, 0, 1, 1], [], []>} : vector<32x64xbf16>, vector<64x64xbf16>, vector<32x64xf32> -> vector<32x64xf32>
    %c1_21 = arith.constant 1 : index
    %c0_22 = arith.constant 0 : index
    %c0_23 = arith.constant 0 : index
    %24 = vector.load %arg4[%c1_21, %c0_22, %c0_23] : memref<2x64x64xbf16, #tpu.memory_space<vmem>>, vector<1x64x64xbf16>
    %25 = vector.shape_cast %24 : vector<1x64x64xbf16> to vector<64x64xbf16>
    %cst_24 = arith.constant dense<0.000000e+00> : vector<32x64xf32>
    %26 = tpu.matmul %20, %25, %cst_24 {dimension_numbers = #tpu.dot_dimension_numbers<[1], [0], [0], [1], [0, 0, 1, 1], [], []>} : vector<32x64xbf16>, vector<64x64xbf16>, vector<32x64xf32> -> vector<32x64xf32>
    %27 = arith.truncf %26 : vector<32x64xf32> to vector<32x64xbf16>
    %c16_25 = arith.constant 16 : index
    %c0_26 = arith.constant 0 : index
    %28 = vector.load %arg11[%c16_25, %c0_26] : memref<48x64xbf16, #tpu.memory_space<vmem>>, vector<32x64xbf16>
    tpu.vector_store %arg11[%c16_25, %c0_26], %27 {strides = array<i32>} : memref<48x64xbf16, #tpu.memory_space<vmem>>, vector<32x64xbf16>,
    %c0_27 = arith.constant 0 : index
    %c0_28 = arith.constant 0 : index
    %29 = vector.load %arg11[%c0_27, %c0_28] : memref<48x64xbf16, #tpu.memory_space<vmem>>, vector<32x64xbf16>
    %30 = arith.extf %29 : vector<32x64xbf16> to vector<32x64xf32>
    %31 = arith.addf %23, %30 : vector<32x64xf32>
    %c0_29 = arith.constant 0 : index
    %c0_30 = arith.constant 0 : index
    %32 = vector.load %arg5[%c0_29, %c0_30] : memref<1x64xf32, #tpu.memory_space<vmem>>, vector<1x64xf32>
    %33 = vector.broadcast %32 : vector<1x64xf32> to vector<32x64xf32>
    %34 = arith.addf %31, %33 : vector<32x64xf32>
    %cst_31 = arith.constant 0.000000e+00 : f32
    %35 = vector.broadcast %cst_31 : f32 to vector<32x64xf32>
    %36 = arith.maximumf %34, %35 : vector<32x64xf32>
    %37 = arith.truncf %36 : vector<32x64xf32> to vector<32x64xbf16>
    %c0_32 = arith.constant 0 : index
    %c0_33 = arith.constant 0 : index
    %c0_34 = arith.constant 0 : index
    %38 = vector.load %arg6[%c0_32, %c0_33, %c0_34] : memref<2x64x64xbf16, #tpu.memory_space<vmem>>, vector<1x64x64xbf16>
    %39 = vector.shape_cast %38 : vector<1x64x64xbf16> to vector<64x64xbf16>
    %cst_35 = arith.constant dense<0.000000e+00> : vector<32x64xf32>
    %40 = tpu.matmul %37, %39, %cst_35 {dimension_numbers = #tpu.dot_dimension_numbers<[1], [0], [0], [1], [0, 0, 1, 1], [], []>} : vector<32x64xbf16>, vector<64x64xbf16>, vector<32x64xf32> -> vector<32x64xf32>
    %c1_36 = arith.constant 1 : index
    %c0_37 = arith.constant 0 : index
    %c0_38 = arith.constant 0 : index
    %41 = vector.load %arg6[%c1_36, %c0_37, %c0_38] : memref<2x64x64xbf16, #tpu.memory_space<vmem>>, vector<1x64x64xbf16>
    %42 = vector.shape_cast %41 : vector<1x64x64xbf16> to vector<64x64xbf16>
    %cst_39 = arith.constant dense<0.000000e+00> : vector<32x64xf32>
    %43 = tpu.matmul %37, %42, %cst_39 {dimension_numbers = #tpu.dot_dimension_numbers<[1], [0], [0], [1], [0, 0, 1, 1], [], []>} : vector<32x64xbf16>, vector<64x64xbf16>, vector<32x64xf32> -> vector<32x64xf32>
    %44 = arith.truncf %43 : vector<32x64xf32> to vector<32x64xbf16>
    %c16_40 = arith.constant 16 : index
    %c0_41 = arith.constant 0 : index
    %45 = vector.load %arg11[%c16_40, %c0_41] : memref<48x64xbf16, #tpu.memory_space<vmem>>, vector<32x64xbf16>
    tpu.vector_store %arg11[%c16_40, %c0_41], %44 {strides = array<i32>} : memref<48x64xbf16, #tpu.memory_space<vmem>>, vector<32x64xbf16>,
    %c0_42 = arith.constant 0 : index
    %c0_43 = arith.constant 0 : index
    %46 = vector.load %arg11[%c0_42, %c0_43] : memref<48x64xbf16, #tpu.memory_space<vmem>>, vector<32x64xbf16>
    %47 = arith.extf %46 : vector<32x64xbf16> to vector<32x64xf32>
    %48 = arith.addf %40, %47 : vector<32x64xf32>
    %c0_44 = arith.constant 0 : index
    %c0_45 = arith.constant 0 : index
    %49 = vector.load %arg7[%c0_44, %c0_45] : memref<1x64xf32, #tpu.memory_space<vmem>>, vector<1x64xf32>
    %50 = vector.broadcast %49 : vector<1x64xf32> to vector<32x64xf32>
    %51 = arith.addf %48, %50 : vector<32x64xf32>
    %cst_46 = arith.constant 0.000000e+00 : f32
    %52 = vector.broadcast %cst_46 : f32 to vector<32x64xf32>
    %53 = arith.maximumf %51, %52 : vector<32x64xf32>
    %54 = arith.truncf %53 : vector<32x64xf32> to vector<32x64xbf16>
    %c16_47 = arith.constant 16 : index
    %c0_48 = arith.constant 0 : index
    %55 = vector.load %arg11[%c16_47, %c0_48] : memref<48x64xbf16, #tpu.memory_space<vmem>>, vector<32x64xbf16>
    tpu.vector_store %arg11[%c16_47, %c0_48], %54 {strides = array<i32>} : memref<48x64xbf16, #tpu.memory_space<vmem>>, vector<32x64xbf16>,
    %cst_49 = arith.constant 0.000000e+00 : f32
    %56 = vector.broadcast %cst_49 : f32 to vector<16x32xf32>
    %c0_i32 = arith.constant 0 : i32
    %c2_i32 = arith.constant 2 : i32
    %57 = arith.addi %c0_i32, %c2_i32 : i32
    %c1_i32 = arith.constant 1 : i32
    %58 = scf.for %arg12 = %c0_i32 to %57 step %c1_i32 iter_args(%arg13 = %56) -> (vector<16x32xf32>)  : i32 {
      %c1_i32_55 = arith.constant 1 : i32
      %63 = arith.addi %arg12, %c1_i32_55 : i32
      %c16_i32 = arith.constant 16 : i32
      %64 = arith.muli %63, %c16_i32 : i32
      %65 = tpu.assume_multiple %64, 16 : i32
      %c64_i32 = arith.constant 64 : i32
      %66 = arith.muli %arg12, %c64_i32 : i32
      %67 = tpu.assume_multiple %66, 64 : i32
      %68 = arith.index_cast %65 : i32 to index
      %c0_56 = arith.constant 0 : index
      %69 = vector.load %arg11[%68, %c0_56] : memref<48x64xbf16, #tpu.memory_space<vmem>>, vector<16x64xbf16>
      %70 = arith.index_cast %67 : i32 to index
      %c0_57 = arith.constant 0 : index
      %71 = vector.load %arg8[%70, %c0_57] : memref<128x32xbf16, #tpu.memory_space<vmem>>, vector<64x32xbf16>
      %cst_58 = arith.constant dense<0.000000e+00> : vector<16x32xf32>
      %72 = tpu.matmul %69, %71, %cst_58 {dimension_numbers = #tpu.dot_dimension_numbers<[1], [0], [0], [1], [0, 0, 1, 1], [], []>} : vector<16x64xbf16>, vector<64x32xbf16>, vector<16x32xf32> -> vector<16x32xf32>
      %73 = arith.addf %arg13, %72 : vector<16x32xf32>
      scf.yield %73 : vector<16x32xf32>
    }
    %c2_i32_50 = arith.constant 2 : i32
    %c0_51 = arith.constant 0 : index
    %c0_52 = arith.constant 0 : index
    %59 = vector.load %arg9[%c0_51, %c0_52] : memref<1x32xf32, #tpu.memory_space<vmem>>, vector<1x32xf32>
    %60 = vector.broadcast %59 : vector<1x32xf32> to vector<16x32xf32>
    %61 = arith.addf %58, %60 : vector<16x32xf32>
    %c0_53 = arith.constant 0 : index
    %c0_54 = arith.constant 0 : index
    %62 = vector.load %arg10[%c0_53, %c0_54] : memref<16x32xf32, #tpu.memory_space<vmem>>, vector<16x32xf32>
    tpu.vector_store %arg10[%c0_53, %c0_54], %61 {strides = array<i32>} : memref<16x32xf32, #tpu.memory_space<vmem>>, vector<16x32xf32>,
    return
  }
  func.func @transform_0(%arg0: i32) -> (i32, i32, i32) {
    %c0_i32 = arith.constant 0 : i32
    %c0_i32_0 = arith.constant 0 : i32
    %c0_i32_1 = arith.constant 0 : i32
    return %arg0, %c0_i32, %c0_i32_0 : i32, i32, i32
  }
  func.func @transform_1(%arg0: i32) -> (i32, i32, i32) {
    %c0_i32 = arith.constant 0 : i32
    %c0_i32_0 = arith.constant 0 : i32
    %c0_i32_1 = arith.constant 0 : i32
    %c0_i32_2 = arith.constant 0 : i32
    return %c0_i32, %c0_i32_0, %c0_i32_1 : i32, i32, i32
  }
  func.func @transform_2(%arg0: i32) -> (i32, i32) {
    %c0_i32 = arith.constant 0 : i32
    %c0_i32_0 = arith.constant 0 : i32
    %c0_i32_1 = arith.constant 0 : i32
    return %c0_i32, %c0_i32_0 : i32, i32
  }
  func.func @transform_3(%arg0: i32) -> (i32, i32, i32) {
    %c0_i32 = arith.constant 0 : i32
    %c0_i32_0 = arith.constant 0 : i32
    %c0_i32_1 = arith.constant 0 : i32
    %c0_i32_2 = arith.constant 0 : i32
    return %c0_i32, %c0_i32_0, %c0_i32_1 : i32, i32, i32
  }
  func.func @transform_4(%arg0: i32) -> (i32, i32) {
    %c0_i32 = arith.constant 0 : i32
    %c0_i32_0 = arith.constant 0 : i32
    %c0_i32_1 = arith.constant 0 : i32
    return %c0_i32, %c0_i32_0 : i32, i32
  }
  func.func @transform_5(%arg0: i32) -> (i32, i32, i32) {
    %c0_i32 = arith.constant 0 : i32
    %c0_i32_0 = arith.constant 0 : i32
    %c0_i32_1 = arith.constant 0 : i32
    %c0_i32_2 = arith.constant 0 : i32
    return %c0_i32, %c0_i32_0, %c0_i32_1 : i32, i32, i32
  }
  func.func @transform_6(%arg0: i32) -> (i32, i32) {
    %c0_i32 = arith.constant 0 : i32
    %c0_i32_0 = arith.constant 0 : i32
    %c0_i32_1 = arith.constant 0 : i32
    return %c0_i32, %c0_i32_0 : i32, i32
  }
  func.func @transform_7(%arg0: i32) -> (i32, i32) {
    %c0_i32 = arith.constant 0 : i32
    %c0_i32_0 = arith.constant 0 : i32
    %c0_i32_1 = arith.constant 0 : i32
    return %c0_i32, %c0_i32_0 : i32, i32
  }
  func.func @transform_8(%arg0: i32) -> (i32, i32) {
    %c0_i32 = arith.constant 0 : i32
    %c0_i32_0 = arith.constant 0 : i32
    %c0_i32_1 = arith.constant 0 : i32
    return %c0_i32, %c0_i32_0 : i32, i32
  }
  func.func @transform_9(%arg0: i32) -> (i32, i32) {
    %c0_i32 = arith.constant 0 : i32
    %c0_i32_0 = arith.constant 0 : i32
    return %arg0, %c0_i32 : i32, i32
  }
}

</mosaic_0001>

<bundles_post_ra>
// kernel: ecg_encoder_forward.1
= control target key start
LH: loop header
LB: loop body
LE: loop exit
PB: predicated region body
PF: predicated region fallthrough
CT: control target
= control target key end

     0   :  { %vm70_vm0 = vcmask 261120   ;;  %vm33_vm1 = vcmask 523264   ;;  %v995_v6 = vmov 0   ;;  %s1179_s1 = inlined_call_operand.vmem [shape: bf16[2,32,64], index: 1, kind: input, shape index: {}]   ;;  %s1180_s7 = inlined_call_operand.vmem [shape: bf16[128,32], index: 7, kind: input, shape index: {}]   ;;  %s1181_s8 = inlined_call_operand.vmem [shape: f32[1,32], index: 8, kind: input, shape index: {}]   ;;  %s1182_s9 = inlined_call_operand.vmem [shape: f32[16,32], index: 9, kind: output, shape index: {}]   ;;  %s1183_s0 = inlined_call_operand.vmem [shape: bf16[1,32,32], index: 0, kind: input, shape index: {}]   ;;  %s1184_s3 = inlined_call_operand.vmem [shape: bf16[2,64,64], index: 3, kind: input, shape index: {}]   ;;  %s1185_s2 = inlined_call_operand.vmem [shape: f32[1,64], index: 2, kind: input, shape index: {}]   ;;  %s1186_s5 = inlined_call_operand.vmem [shape: bf16[2,64,64], index: 5, kind: input, shape index: {}]   ;;  %s1187_s4 = inlined_call_operand.vmem [shape: f32[1,64], index: 4, kind: input, shape index: {}]   ;;  %s1188_s6 = inlined_call_operand.vmem [shape: f32[1,64], index: 6, kind: input, shape index: {}]  }
   0x1   :  { %v945_v0 = vld [vmem:[%s1179_s1 + $0x10] sm:$0xff]   ;;  %v946_v1 = vld [vmem:[%s1179_s1 + $0x18] sm:$0xff]   ;;  %v947_v2 = vld [vmem:[%s1183_s0] sm:$0xff]   ;;  %34 = vst.msk [vmem:[#allocation2] sm:$0xff] %vm33_vm1, %v995_v6 }
   0x2   :  { %842 = vmatprep.subr.bf16.mxu0 %v945_v0  ;;  %846 = vmatprep.mubr.msk.bf16.mxu0 %vm70_vm0, %v947_v2  ;;  %v949_v3 = vld [vmem:[%s1179_s1] sm:$0xff]   ;;  %v950_v4 = vld [vmem:[%s1179_s1 + $0x8] sm:$0xff]   ;;  %v955_v11 = vld [vmem:[%s1184_s3 + $0x30] sm:$0xff]  }
   0x3   :  { %843 = vmatpush3.bf16.msra.mxu0 %v945_v0  ;;  %854 = vmatprep.mubr.msk.bf16.mxu1 %vm70_vm0, %v947_v2  ;;  %v948_v5 = vld [vmem:[%s1183_s0 + $0x8] sm:$0xff]   ;;  %v951_v7 = vld [vmem:[%s1184_s3 + $0x20] sm:$0xff]   ;;  %v956_v12 = vld [vmem:[%s1184_s3 + $0x10] sm:$0xff]  }
   0x4   :  { %844 = vmatprep.subr.bf16.mxu0 %v946_v1  ;;  %850 = vmatprep.subr.bf16.mxu1 %v949_v3  ;;  %v952_v8 = vld [vmem:[%s1184_s3] sm:$0xff]   ;;  %v953_v9 = vld [vmem:[%s1184_s3 + $0x28] sm:$0xff]   ;;  %v957_v13 = vld [vmem:[%s1184_s3 + $0x38] sm:$0xff]  }
   0x5   :  { %851 = vmatpush3.bf16.msra.mxu1 %v949_v3  ;;  %v954_v10 = vld [vmem:[%s1184_s3 + $0x8] sm:$0xff]   ;;  %v958_v14 = vld [vmem:[%s1184_s3 + $0x18] sm:$0xff]   ;;  %v750_v25 = vld [vmem:[%s1185_s2] ss:$0 sm:$0xff] }
   0x6   :  { %852 = vmatprep.subr.bf16.mxu1 %v950_v4  ;;  %v959_v46 = vld [vmem:[%s1186_s5 + $0x20] sm:$0xff]   ;;  %v961_v48 = vld [vmem:[%s1186_s5 + $0x28] sm:$0xff]   ;;  %v963_v50 = vld [vmem:[%s1186_s5 + $0x30] sm:$0xff]  }
   0x7   :  { %845 = vmatpush3.bf16.msra.mxu0 %v946_v1  ;;  %v960_v47 = vld [vmem:[%s1186_s5] sm:$0xff]   ;;  %v962_v49 = vld [vmem:[%s1186_s5 + $0x8] sm:$0xff]   ;;  %v964_v51 = vld [vmem:[%s1186_s5 + $0x10] sm:$0xff]  }
   0x8   :  { %858 = vmatprep.subr.bf16.mxu0 %v951_v7  ;;  %v130_v15 = vld [vmem:[#allocation2] sm:$0xff]  ;;  %v965_v52 = vld [vmem:[%s1186_s5 + $0x38] sm:$0xff]  }
   0x9   :  { %853 = vmatpush3.bf16.msra.mxu1 %v950_v4  ;;  %v1095_v19 = vunpack.c.l.bf16 %v130_v15  ;;  %v1097_v24 = vunpack.c.h.bf16 %v130_v15  ;;  %v966_v53 = vld [vmem:[%s1186_s5 + $0x18] sm:$0xff]   ;;  %v771_v58 = vld [vmem:[%s1187_s4] ss:$0 sm:$0xff] }
   0xa   :  { %847 = vmatmul.mubr.msk.bf16.vlgmr.msra.gmra.mrb[0].mxu0 %vm70_vm0, %v948_v5  ;;  %870 = vmatprep.subr.bf16.mxu1 %v952_v8 }
   0xb   :  { %859 = vmatpush3.bf16.msra.mxu0 %v951_v7 }
   0xc   :  { %855 = vmatmul.mubr.msk.bf16.vlgmr.msra.gmra.mrb[0].mxu1 %vm70_vm0, %v948_v5  ;;  %860 = vmatprep.subr.bf16.mxu0 %v953_v9 }
   0xd   :  { %871 = vmatpush3.bf16.msra.mxu1 %v952_v8 }
   0xe   :  { %872 = vmatprep.subr.bf16.mxu1 %v954_v10 }
   0xf   :  { %861 = vmatpush3.bf16.msra.mxu0 %v953_v9 }
  0x10   :  { %862 = vmatprep.subr.bf16.mxu0 %v955_v11 }
  0x11   :  { %873 = vmatpush3.bf16.msra.mxu1 %v954_v10 }
  0x12   :  { %874 = vmatprep.subr.bf16.mxu1 %v956_v12 }
  0x13   :  { %863 = vmatpush3.bf16.msra.mxu0 %v955_v11 }
  0x14   :  { %864 = vmatprep.subr.bf16.mxu0 %v957_v13 }
  0x15   :  { %875 = vmatpush3.bf16.msra.mxu1 %v956_v12 }
  0x16   :  { %876 = vmatprep.subr.bf16.mxu1 %v958_v14 }
  0x17   :  { %865 = vmatpush3.bf16.msra.mxu0 %v957_v13 }
  0x18   :  { %882 = vmatprep.subr.bf16.mxu0 %v959_v46 }
  0x19   :  { %877 = vmatpush3.bf16.msra.mxu1 %v958_v14 }
  0x1a   :  { %894 = vmatprep.subr.bf16.mxu1 %v960_v47 }
  0xdd   :  { %v848_v16 = vpop.f32.mrb[0].mxu0 }
  0xde   :  { %v111_v17 = vpop.f32.mrb[1].mxu0 }
  0xdf   :  { %v849_v18 = vpop.f32.mrb[2].mxu0  ;;  %v856_v23 = vpop.f32.mrb[0].mxu1 }
  0xe0   :  { %v127_v20 = vpack.c.bf16 %v849_v18, %v848_v16  ;;  %v114_v21 = vpop.f32.mrb[3].mxu0  ;;  %v182_v26 = vpop.f32.mrb[1].mxu1 }
  0xe1   :  { %v126_v22 = vpack.c.bf16 %v114_v21, %v111_v17  ;;  %v183_v27 = vadd.f32 %v182_v26, %v1095_v19  ;;  %v857_v28 = vpop.f32.mrb[2].mxu1 }
  0xe2   :  { %129 = vst.msk [vmem:[#allocation2 + $0x10] sm:$0xff] %vm33_vm1, %v127_v20  ;;  %v185_v29 = vpop.f32.mrb[3].mxu1 }
  0xe3   :  { %128 = vst.msk [vmem:[#allocation2 + $0x8] sm:$0xff] %vm33_vm1, %v126_v22  ;;  %v204_v30 = vadd.f32 %v750_v25, %v183_v27  ;;  %v186_v31 = vadd.f32 %v185_v29, %v1097_v24 }
  0xe5   :  { %v208_v32 = vmax.f32 %v204_v30, 0.0  ;;  %v205_v33 = vadd.f32 %v750_v25, %v186_v31 }
  0xe7   :  { %v209_v34 = vmax.f32 %v205_v33, 0.0 }
  0xe9   :  { %v212_v38 = vpack.c.bf16 %v209_v34, %v208_v32 }
  0xea   :  { %v131_v35 = vld [vmem:[#allocation2 + $0x8] sm:$0xff] }
  0xeb   :  { %v134_v36 = vunpack.c.l.bf16 %v131_v35  ;;  %v135_v37 = vunpack.c.h.bf16 %v131_v35  ;;  %866 = vmatprep.mubr.msk.bf16.mxu0 %vm33_vm1, %v212_v38  ;;  %878 = vmatprep.mubr.msk.bf16.mxu1 %vm33_vm1, %v212_v38 }
  0xed   :  { %v191_v39 = vadd.f32 %v856_v23, %v134_v36  ;;  %v194_v40 = vadd.f32 %v857_v28, %v135_v37  ;;  %v792_v23 = vld [vmem:[%s1188_s6] ss:$0 sm:$0xff]  ;;  %s1154_s6 = smov 0  }
  0xef   :  { %v206_v41 = vadd.f32 %v750_v25, %v191_v39  ;;  %v207_v42 = vadd.f32 %v750_v25, %v194_v40 }
  0xf1   :  { %v210_v43 = vmax.f32 %v206_v41, 0.0  ;;  %v211_v44 = vmax.f32 %v207_v42, 0.0 }
  0xf3   :  { %v213_v45 = vpack.c.bf16 %v211_v44, %v210_v43 }
  0xf5   :  { %867 = vmatmul.mubr.msk.bf16.vlgmr.msra.gmra.mrb[4].mxu0 %vm33_vm1, %v213_v45  ;;  %879 = vmatmul.mubr.msk.bf16.vlgmr.msra.gmra.mrb[4].mxu1 %vm33_vm1, %v213_v45 }
  0xf6   :  { %883 = vmatpush3.bf16.msra.mxu0 %v959_v46  ;;  %895 = vmatpush3.bf16.msra.mxu1 %v960_v47  ;;  %v983_v46 = vmov 0.0   ;;  %v987_v47 = vmov 0.0  }
  0xf7   :  { %884 = vmatprep.subr.bf16.mxu0 %v961_v48  ;;  %896 = vmatprep.subr.bf16.mxu1 %v962_v49 }
  0xfa   :  { %885 = vmatpush3.bf16.msra.mxu0 %v961_v48  ;;  %897 = vmatpush3.bf16.msra.mxu1 %v962_v49 }
  0xfb   :  { %886 = vmatprep.subr.bf16.mxu0 %v963_v50  ;;  %898 = vmatprep.subr.bf16.mxu1 %v964_v51 }
  0xfe   :  { %887 = vmatpush3.bf16.msra.mxu0 %v963_v50  ;;  %899 = vmatpush3.bf16.msra.mxu1 %v964_v51 }
  0xff   :  { %888 = vmatprep.subr.bf16.mxu0 %v965_v52  ;;  %900 = vmatprep.subr.bf16.mxu1 %v966_v53 }
 0x102   :  { %889 = vmatpush3.bf16.msra.mxu0 %v965_v52  ;;  %901 = vmatpush3.bf16.msra.mxu1 %v966_v53 }
 0x1c8   :  { %v868_v54 = vpop.f32.mrb[4].mxu0  ;;  %v880_v55 = vpop.f32.mrb[4].mxu1 }
 0x1c9   :  { %v295_v56 = vpop.f32.mrb[5].mxu0  ;;  %v378_v57 = vpop.f32.mrb[5].mxu1 }
 0x1ca   :  { %v379_v59 = vadd.f32 %v378_v57, %v1095_v19  ;;  %v869_v60 = vpop.f32.mrb[6].mxu0  ;;  %v881_v61 = vpop.f32.mrb[6].mxu1 }
 0x1cb   :  { %v311_v62 = vpack.c.bf16 %v869_v60, %v868_v54  ;;  %v298_v63 = vpop.f32.mrb[7].mxu0  ;;  %v381_v0 = vpop.f32.mrb[7].mxu1 }
 0x1cc   :  { %v400_v1 = vadd.f32 %v771_v58, %v379_v59  ;;  %v310_v2 = vpack.c.bf16 %v298_v63, %v295_v56  ;;  %v382_v3 = vadd.f32 %v381_v0, %v1097_v24 }
 0x1cd   :  { %313 = vst.msk [vmem:[#allocation2 + $0x10] sm:$0xff] %vm33_vm1, %v311_v62 }
 0x1ce   :  { %312 = vst.msk [vmem:[#allocation2 + $0x8] sm:$0xff] %vm33_vm1, %v310_v2  ;;  %v401_v4 = vadd.f32 %v771_v58, %v382_v3  ;;  %v404_v5 = vmax.f32 %v400_v1, 0.0 }
 0x1d0   :  { %v405_v6 = vmax.f32 %v401_v4, 0.0 }
 0x1d2   :  { %v408_v7 = vpack.c.bf16 %v405_v6, %v404_v5 }
 0x1d4   :  { %890 = vmatprep.mubr.msk.bf16.mxu0 %vm33_vm1, %v408_v7  ;;  %902 = vmatprep.mubr.msk.bf16.mxu1 %vm33_vm1, %v408_v7 }
 0x1d5   :  { %v315_v8 = vld [vmem:[#allocation2 + $0x8] sm:$0xff] }
 0x1d6   :  { %v318_v9 = vunpack.c.l.bf16 %v315_v8  ;;  %v319_v10 = vunpack.c.h.bf16 %v315_v8 }
 0x1d8   :  { %v387_v11 = vadd.f32 %v880_v55, %v318_v9  ;;  %v390_v12 = vadd.f32 %v881_v61, %v319_v10 }
 0x1da   :  { %v402_v13 = vadd.f32 %v771_v58, %v387_v11  ;;  %v403_v14 = vadd.f32 %v771_v58, %v390_v12 }
 0x1dc   :  { %v406_v15 = vmax.f32 %v402_v13, 0.0  ;;  %v407_v16 = vmax.f32 %v403_v14, 0.0 }
 0x1de   :  { %v409_v17 = vpack.c.bf16 %v407_v16, %v406_v15 }
 0x1e0   :  { %891 = vmatmul.mubr.msk.bf16.vlgmr.msra.gmra.mrb[8].mxu0 %vm33_vm1, %v409_v17  ;;  %903 = vmatmul.mubr.msk.bf16.vlgmr.msra.gmra.mrb[8].mxu1 %vm33_vm1, %v409_v17 }
 0x2b3   :  { %v892_v18 = vpop.f32.mrb[8].mxu0  ;;  %v904_v20 = vpop.f32.mrb[8].mxu1 }
 0x2b4   :  { %v491_v21 = vpop.f32.mrb[9].mxu0  ;;  %v574_v22 = vpop.f32.mrb[9].mxu1 }
 0x2b5   :  { %v575_v25 = vadd.f32 %v574_v22, %v1095_v19  ;;  %v893_v26 = vpop.f32.mrb[10].mxu0  ;;  %v905_v27 = vpop.f32.mrb[10].mxu1 }
 0x2b6   :  { %v507_v28 = vpack.c.bf16 %v893_v26, %v892_v18  ;;  %v494_v29 = vpop.f32.mrb[11].mxu0  ;;  %v577_v30 = vpop.f32.mrb[11].mxu1 }
 0x2b7   :  { %v596_v31 = vadd.f32 %v792_v23, %v575_v25  ;;  %v506_v32 = vpack.c.bf16 %v494_v29, %v491_v21  ;;  %v578_v33 = vadd.f32 %v577_v30, %v1097_v24 }
 0x2b8   :  { %509 = vst.msk [vmem:[#allocation2 + $0x10] sm:$0xff] %vm33_vm1, %v507_v28 }
 0x2b9   :  { %508 = vst.msk [vmem:[#allocation2 + $0x8] sm:$0xff] %vm33_vm1, %v506_v32  ;;  %v597_v34 = vadd.f32 %v792_v23, %v578_v33  ;;  %v600_v35 = vmax.f32 %v596_v31, 0.0 }
 0x2bb   :  { %v601_v36 = vmax.f32 %v597_v34, 0.0 }
 0x2bd   :  { %v604_v37 = vpack.c.bf16 %v601_v36, %v600_v35 }
 0x2c0   :  { %v511_v38 = vld [vmem:[#allocation2 + $0x8] sm:$0xff] }
 0x2c1   :  { %v514_v39 = vunpack.c.l.bf16 %v511_v38  ;;  %v515_v19 = vunpack.c.h.bf16 %v511_v38  ;;  %606 = vst.msk [vmem:[#allocation2 + $0x8] sm:$0xff] %vm33_vm1, %v604_v37 }
 0x2c3   :  { %v583_v40 = vadd.f32 %v904_v20, %v514_v39  ;;  %v586_v41 = vadd.f32 %v905_v27, %v515_v19 }
 0x2c5   :  { %v598_v42 = vadd.f32 %v792_v23, %v583_v40  ;;  %v599_v43 = vadd.f32 %v792_v23, %v586_v41 }
 0x2c7   :  { %v602_v44 = vmax.f32 %v598_v42, 0.0  ;;  %v603_v45 = vmax.f32 %v599_v43, 0.0 }
 0x2c9   :  { %v605_v24 = vpack.c.bf16 %v603_v45, %v602_v44 }
 0x2cb   :  { %607 = vst.msk [vmem:[#allocation2 + $0x10] sm:$0xff] %vm33_vm1, %v605_v24 }
 0x2cc LB: > { %v996_v48 = vmov 0.0   ;;  %vm997_vm2 = vmmov 0   ;;  %s794_s30 = sshll.u32 %s993_s6, 6  ;;  %s803_s3 = sshll.u32 %s993_s6, 4  ;;  %s993_s6 = sphi %s1154_s6, %s613_s6   ;;  %v989_v47 = vphi %v987_v47, %v988_v47   ;;  %v985_v46 = vphi %v983_v46, %v984_v46  }
 0x2cd   : > { %906 = vmatprep.subr.bf16.mxu0 %v996_v48  ;;  %914 = vmatprep.mubr.msk.bf16.mxu0 %vm997_vm2, %v996_v48  ;;  %s624_s10 = sshra.s32 %s794_s30, 3  ;;  %s804_s2 = sadd.s32 16, %s803_s3 }
 0x2ce   : > { %s796_s11 = sshll.u32 %s624_s10, 2  ;;  %s619_s15 = sshra.s32 %s804_s2, 4 }
 0x2cf   : > { %s627_s14 = scalar_lea.vmem %s1180_s7, %s796_s11  ;;  %s795_s16 = sshll.u32 %s619_s15, 3 }
 0x2d0   : > { %v967_v49 = vld [vmem:[%s627_s14] sm:$0xff]   ;;  %v968_v50 = vld [vmem:[%s627_s14 + $0x8] sm:$0xff]   ;;  %v969_v51 = vld [vmem:[%s627_s14 + $0x10] sm:$0xff]   ;;  %s622_s17 = scalar_lea.vmem [#allocation2], %s795_s16  ;;  %s613_s6 = sadd.s32 1, %s993_s6  }
 0x2d1   : > { %907 = vmatpush3.bf16.msra.mxu0 %v967_v49  ;;  %v970_v52 = vld [vmem:[%s627_s14 + $0x18] sm:$0xff]   ;;  %p610_p0 = scmp.ge.s32.totalorder %s613_s6, 2  }
 0x2d2   : > { %908 = vmatprep.subr.bf16.mxu0 %v996_v48  ;;  %v623_v53 = vld [vmem:[%s622_s17] sm:$0xff] }
 0x2d3   :  { %v802_v60 = vld [vmem:[%s1181_s8] ss:$0 sm:$0xff] (%p610_p0) }
 0x2d5   : > { %909 = vmatpush3.bf16.msra.mxu0 %v968_v50 }
 0x2d6   : > { %910 = vmatprep.subr.bf16.mxu0 %v996_v48 }
 0x2d9   : > { %911 = vmatpush3.bf16.msra.mxu0 %v969_v51 }
 0x2da   : > { %912 = vmatprep.subr.bf16.mxu0 %v996_v48 }
 0x2dd   : > { %913 = vmatpush3.bf16.msra.mxu0 %v970_v52 }
 0x2e0   : > { %915 = vmatmul.mubr.msk.bf16.vlgmr.msra.gmra.mrb[0].mxu0 %vm33_vm1, %v623_v53 }
 0x3b2   :  { %612 = sbr.rel (!%p610_p0) target bundleno = 716 (0x2cc), region = 68 }
 0x3b3   : > { %v697_v54 = vpop.f32.mrb[0].mxu0 }
 0x3b4   : > { %v704_v55 = vadd.f32 %v989_v47, %v697_v54   ;;  %v916_v56 = vpop.f32.mrb[1].mxu0 }
 0x3b5   : > { %v700_v57 = vpop.f32.mrb[2].mxu0 }
 0x3b6   : > { %v705_v58 = vadd.f32 %v985_v46, %v700_v57   ;;  %v917_v59 = vpop.f32.mrb[3].mxu0  ;;  %v988_v47 = vmov %v704_v55   ;;  %v713_v61 = vadd.f32 (%p610_p0), %v802_v60, %v704_v55 }
 0x3b8   : > { %v984_v46 = vmov %v705_v58   ;;  %v714_v62 = vadd.f32 (%p610_p0), %v802_v60, %v705_v58  ;;  %715 = vst.msk [vmem:[%s1182_s9] sm:$0xff] (%p610_p0), %vm70_vm0, %v713_v61 }
 0x3ba   :  { %716 = vst.msk [vmem:[%s1182_s9 + $0x8] sm:$0xff] %vm70_vm0, %v714_v62 }

</bundles_post_ra>
